<compile_context>
chip_gen: v6e
topology: v6e:2x2x1
jax: 0.10.0
libtpu: 0.0.40
codegen_flags: <defaults>
</compile_context>

<pallas_src>
import functools
import math

import jax
import jax.numpy as jnp
from jax import lax
from jax.experimental import pallas as pl
from jax.experimental.pallas import tpu as pltpu


def _largest_divisor_leq(n, cap):
    best = 1
    for d in range(1, n + 1):
        if n % d == 0 and d <= cap:
            best = d
    return best


def _pick_q_tile(S, q_tile_max=256):
    if S <= q_tile_max:
        return S
    for cand in range(q_tile_max, 7, -1):
        if S % cand == 0 and cand % 8 == 0:
            return cand
    # TODO(synk): awkward S with no sublane-aligned divisor <= q_tile_max falls
    # back to a single full-S tile (correct, just larger live ranges).
    return S


def bert_self_attention_kernel(hidden_ref, mask_ref, wqkv_ref, bqkv_ref,
                               out_ref, q_scr, k_scr, v_scr, *,
                               num_heads, head_dim, scale, tq, Bt, S, H):
    # hidden_ref: (Bt, S, H)  mask_ref: (Bt, 1, S) additive f32
    # wqkv_ref: (H, 3H)  bqkv_ref: (1, 3H) f32   out_ref: (Bt, S, H)
    # q_scr/k_scr/v_scr: (Bt, S, H) VMEM scratch in the model dtype.

    # Fused QKV projection over all Bt*S rows: one lane-dense MXU matmul,
    # operands kept in their native dtype, f32 accumulation.
    x2 = hidden_ref[...].reshape(Bt * S, H)
    qkv = jnp.dot(x2, wqkv_ref[...],
                  preferred_element_type=jnp.float32) + bqkv_ref[...]

    dt = q_scr.dtype
    q_scr[...] = (qkv[:, :H] * scale).reshape(Bt, S, H).astype(dt)  # scale folded once
    k_scr[...] = qkv[:, H:2 * H].reshape(Bt, S, H).astype(dt)
    v_scr[...] = qkv[:, 2 * H:].reshape(Bt, S, H).astype(dt)

    num_q_tiles = S // tq

    for b in range(Bt):                       # Bt is a compile-time constant
        kb = k_scr[b]                         # (S, H)
        vb = v_scr[b]                         # (S, H)
        mask_b = mask_ref[b].astype(jnp.float32)  # (1, S) -> broadcasts to (tq, S)

        def attend(qt, kb=kb, vb=vb, mask_b=mask_b):
            # qt: (rows, H) -> ctx: (rows, H) f32; static lane slices per head.
            ctx_heads = []
            for h in range(num_heads):
                lo = h * head_dim
                hi = lo + head_dim
                s = jnp.einsum('qd,kd->qk', qt[:, lo:hi], kb[:, lo:hi],
                               preferred_element_type=jnp.float32) + mask_b
                m = jnp.max(s, axis=-1, keepdims=True)
                p = jnp.exp(s - m)
                denom = jnp.sum(p, axis=-1, keepdims=True)
                probs = (p * pl.reciprocal(denom, approx=True)).astype(vb.dtype)
                # TODO(synk): attention-probs dropout / head_mask /
                # output_attentions are eval-mode identities here.
                ctx_heads.append(jnp.dot(probs, vb[:, lo:hi],
                                         preferred_element_type=jnp.float32))
            # One lane-dense (rows, H) slab instead of per-head partial stores.
            return jnp.concatenate(ctx_heads, axis=-1)

        if num_q_tiles == 1:
            out_ref[b] = attend(q_scr[b]).astype(out_ref.dtype)
        else:
            def body(t, carry, b=b, attend=attend):
                q0 = pl.multiple_of(t * tq, tq)
                qt = q_scr[b, pl.ds(q0, tq), :]
                out_ref[b, pl.ds(q0, tq), :] = attend(qt).astype(out_ref.dtype)
                return carry
            lax.fori_loop(0, num_q_tiles, body, 0)


def bert_self_attention(hidden_states, attention_mask, params, *,
                        num_attention_heads, q_tile_max=256,
                        batch_rows_target=256):
    """hidden_states: (B, S, H); attention_mask: additive key mask of shape
    (B, 1, 1, S) (standard BERT extended mask), (B, 1, S) or (B, S)."""
    B, S, H = hidden_states.shape
    assert H % num_attention_heads == 0
    head_dim = H // num_attention_heads
    scale = 1.0 / math.sqrt(head_dim)

    # Normalize the additive mask to (B, 1, S) — key-padding masks only.
    am = attention_mask
    if am.ndim == 4:
        assert am.shape == (B, 1, 1, S), (
            f"expected (B,1,1,S) key mask, got {am.shape}; per-query masks "
            "(B,1,S,S) are not supported by this kernel")
        am = am.reshape(B, 1, S)
    elif am.ndim == 3:
        assert am.shape == (B, 1, S), f"unexpected mask shape {am.shape}"
    elif am.ndim == 2:
        assert am.shape == (B, S), f"unexpected mask shape {am.shape}"
        am = am.reshape(B, 1, S)
    else:
        raise ValueError(f"unsupported attention_mask shape {am.shape}")
    mask_b1s = am.astype(jnp.float32)

    # Pack the three projections into one weight / bias.
    wqkv = jnp.concatenate([params["wq"], params["wk"], params["wv"]], axis=1)
    bqkv = jnp.concatenate([params["bq"], params["bk"], params["bv"]]
                           ).reshape(1, 3 * H).astype(jnp.float32)

    # Block multiple batches per grid step when per-batch work is small
    # (keeps the projection matmul and the HBM writeback >=128 rows wide).
    if S % 8 == 0 and S < batch_rows_target:
        bt = _largest_divisor_leq(B, max(1, batch_rows_target // S))
    else:
        bt = 1

    tq = _pick_q_tile(S, q_tile_max)

    dtype = hidden_states.dtype
    kernel = functools.partial(
        bert_self_attention_kernel,
        num_heads=num_attention_heads, head_dim=head_dim, scale=scale,
        tq=tq, Bt=bt, S=S, H=H)

    # TODO(synk): on v7x, when B // bt == 1 a second "parallel" grid axis over
    # query blocks would be needed to keep both TensorCores busy.
    out = pl.pallas_call(
        kernel,
        out_shape=jax.ShapeDtypeStruct((B, S, H), dtype),
        grid_spec=pltpu.PrefetchScalarGridSpec(
            num_scalar_prefetch=0,
            grid=(B // bt,),
            in_specs=[
                pl.BlockSpec((bt, S, H), lambda g: (g, 0, 0)),      # hidden slab
                pl.BlockSpec((bt, 1, S), lambda g: (g, 0, 0)),      # (1,S) key mask
                pl.BlockSpec((H, 3 * H), lambda g: (0, 0)),         # fused Wqkv
                pl.BlockSpec((1, 3 * H), lambda g: (0, 0)),         # fused bias
            ],
            out_specs=pl.BlockSpec((bt, S, H), lambda g: (g, 0, 0)),
            scratch_shapes=[
                pltpu.VMEM((bt, S, H), dtype),   # q (pre-scaled)
                pltpu.VMEM((bt, S, H), dtype),   # k
                pltpu.VMEM((bt, S, H), dtype),   # v
            ],
        ),
        compiler_params=pltpu.CompilerParams(
            dimension_semantics=("parallel",),
            # Stay under v7x's 64 MiB physical VMEM; v5e/v6e have 128 MiB and
            # can be raised further if larger S-per-step tiles are desired.
            vmem_limit_bytes=48 * 1024 * 1024,
        ),
    )(hidden_states, mask_b1s, wqkv, bqkv)
    return out


def reference(hidden, attn_mask_b11s, params, num_heads):
    """Pure-JAX reference matching the PyTorch forward (eval mode)."""
    B, S, H = hidden.shape
    d = H // num_heads
    hp = jax.lax.Precision.HIGHEST
    q = jnp.dot(hidden, params["wq"], precision=hp) + params["bq"]
    k = jnp.dot(hidden, params["wk"], precision=hp) + params["bk"]
    v = jnp.dot(hidden, params["wv"], precision=hp) + params["bv"]

    def split(t):
        return t.reshape(B, S, num_heads, d).transpose(0, 2, 1, 3)

    qh, kh, vh = split(q), split(k), split(v)
    scores = jnp.einsum('bhqd,bhkd->bhqk', qh, kh, precision=hp) / math.sqrt(d)
    scores = scores + attn_mask_b11s
    probs = jax.nn.softmax(scores, axis=-1)
    ctx = jnp.einsum('bhqk,bhkd->bhqd', probs, vh, precision=hp)
    return ctx.transpose(0, 2, 1, 3).reshape(B, S, H)


if __name__ == "__main__":
    # hp: hidden_size=32, num_attention_heads=4, attention_probs_dropout_prob
    # treated as 0 (eval), output_attentions=False
    B, S, H, NH = 2, 8, 32, 4

    key = jax.random.PRNGKey(0)
    k_h, k_q, k_k, k_v, k_bq, k_bk, k_bv = jax.random.split(key, 7)
    hidden = jax.random.normal(k_h, (B, S, H), jnp.float32)
    params = {
        "wq": 0.02 * jax.random.normal(k_q, (H, H), jnp.float32),
        "wk": 0.02 * jax.random.normal(k_k, (H, H), jnp.float32),
        "wv": 0.02 * jax.random.normal(k_v, (H, H), jnp.float32),
        "bq": 0.02 * jax.random.normal(k_bq, (H,), jnp.float32),
        "bk": 0.02 * jax.random.normal(k_bk, (H,), jnp.float32),
        "bv": 0.02 * jax.random.normal(k_bv, (H,), jnp.float32),
    }

    # padding mask: batch 0 uses all 8 tokens, batch 1 has the last 2 padded.
    valid = jnp.array([[1.0] * S, [1.0] * 6 + [0.0] * 2], jnp.float32)   # (B, S)
    attn_mask = (1.0 - valid)[:, None, None, :] * -10000.0               # (B,1,1,S)

    out = bert_self_attention(hidden, attn_mask, params, num_attention_heads=NH)
    jax.block_until_ready(out)

    ref = reference(hidden, attn_mask, params, NH)
    assert out.shape == (B, S, H) and out.dtype == jnp.float32
    assert bool(jnp.allclose(out, ref, rtol=1e-3, atol=1e-3))
    print("KERNEL_OK")
</pallas_src>

<mosaic_0001>
module attributes {stable_mosaic.version = 11 : i64} {
  func.func @bert_self_attention_kernel(%arg0: i32, %arg1: memref<2x8x32xf32, #tpu.memory_space<vmem>>, %arg2: memref<2x1x8xf32, #tpu.memory_space<vmem>>, %arg3: memref<32x96xf32, #tpu.memory_space<vmem>>, %arg4: memref<1x96xf32, #tpu.memory_space<vmem>>, %arg5: memref<2x8x32xf32, #tpu.memory_space<vmem>>, %arg6: memref<2x8x32xf32, #tpu.memory_space<vmem>>, %arg7: memref<2x8x32xf32, #tpu.memory_space<vmem>>, %arg8: memref<2x8x32xf32, #tpu.memory_space<vmem>>) attributes {dimension_semantics = [#tpu.dimension_semantics<parallel>], iteration_bounds = array<i64: 1>, scalar_prefetch = 0 : i64, scratch_operands = 3 : i64, tpu.core_type = #tpu.core_type<tc>, window_params = [{transform_indices = @transform_0, window_bounds = array<i64: 2, 8, 32>}, {transform_indices = @transform_1, window_bounds = array<i64: 2, 1, 8>}, {pipeline_mode = #tpu.pipeline_mode<synchronous>, transform_indices = @transform_2, window_bounds = array<i64: 32, 96>}, {pipeline_mode = #tpu.pipeline_mode<synchronous>, transform_indices = @transform_3, window_bounds = array<i64: 1, 96>}, {transform_indices = @transform_4, window_bounds = array<i64: 2, 8, 32>}]} {
    %c0 = arith.constant 0 : index
    %c0_0 = arith.constant 0 : index
    %c0_1 = arith.constant 0 : index
    %0 = vector.load %arg1[%c0, %c0_0, %c0_1] : memref<2x8x32xf32, #tpu.memory_space<vmem>>, vector<2x8x32xf32>
    %1 = vector.shape_cast %0 : vector<2x8x32xf32> to vector<16x32xf32>
    %c0_2 = arith.constant 0 : index
    %c0_3 = arith.constant 0 : index
    %2 = vector.load %arg3[%c0_2, %c0_3] : memref<32x96xf32, #tpu.memory_space<vmem>>, vector<32x96xf32>
    %cst = arith.constant dense<0.000000e+00> : vector<16x96xf32>
    %3 = tpu.matmul %1, %2, %cst {dimension_numbers = #tpu.dot_dimension_numbers<[1], [0], [0], [1], [0, 0, 1, 1], [], []>} : vector<16x32xf32>, vector<32x96xf32>, vector<16x96xf32> -> vector<16x96xf32>
    %c0_4 = arith.constant 0 : index
    %c0_5 = arith.constant 0 : index
    %4 = vector.load %arg4[%c0_4, %c0_5] : memref<1x96xf32, #tpu.memory_space<vmem>>, vector<1x96xf32>
    %5 = vector.broadcast %4 : vector<1x96xf32> to vector<16x96xf32>
    %6 = arith.addf %3, %5 : vector<16x96xf32>
    %7 = vector.extract_strided_slice %6 {offsets = [0, 0], sizes = [16, 32], strides = [1, 1]} : vector<16x96xf32> to vector<16x32xf32>
    %cst_6 = arith.constant 0.353553385 : f32
    %8 = vector.broadcast %cst_6 : f32 to vector<16x32xf32>
    %9 = arith.mulf %7, %8 : vector<16x32xf32>
    %10 = vector.shape_cast %9 : vector<16x32xf32> to vector<2x8x32xf32>
    %c0_7 = arith.constant 0 : index
    %c0_8 = arith.constant 0 : index
    %c0_9 = arith.constant 0 : index
    %11 = vector.load %arg6[%c0_7, %c0_8, %c0_9] : memref<2x8x32xf32, #tpu.memory_space<vmem>>, vector<2x8x32xf32>
    tpu.vector_store %arg6[%c0_7, %c0_8, %c0_9], %10 {strides = array<i32>} : memref<2x8x32xf32, #tpu.memory_space<vmem>>, vector<2x8x32xf32>,
    %12 = vector.extract_strided_slice %6 {offsets = [0, 32], sizes = [16, 32], strides = [1, 1]} : vector<16x96xf32> to vector<16x32xf32>
    %13 = vector.shape_cast %12 : vector<16x32xf32> to vector<2x8x32xf32>
    %c0_10 = arith.constant 0 : index
    %c0_11 = arith.constant 0 : index
    %c0_12 = arith.constant 0 : index
    %14 = vector.load %arg7[%c0_10, %c0_11, %c0_12] : memref<2x8x32xf32, #tpu.memory_space<vmem>>, vector<2x8x32xf32>
    tpu.vector_store %arg7[%c0_10, %c0_11, %c0_12], %13 {strides = array<i32>} : memref<2x8x32xf32, #tpu.memory_space<vmem>>, vector<2x8x32xf32>,
    %15 = vector.extract_strided_slice %6 {offsets = [0, 64], sizes = [16, 32], strides = [1, 1]} : vector<16x96xf32> to vector<16x32xf32>
    %16 = vector.shape_cast %15 : vector<16x32xf32> to vector<2x8x32xf32>
    %c0_13 = arith.constant 0 : index
    %c0_14 = arith.constant 0 : index
    %c0_15 = arith.constant 0 : index
    %17 = vector.load %arg8[%c0_13, %c0_14, %c0_15] : memref<2x8x32xf32, #tpu.memory_space<vmem>>, vector<2x8x32xf32>
    tpu.vector_store %arg8[%c0_13, %c0_14, %c0_15], %16 {strides = array<i32>} : memref<2x8x32xf32, #tpu.memory_space<vmem>>, vector<2x8x32xf32>,
    %c0_16 = arith.constant 0 : index
    %c0_17 = arith.constant 0 : index
    %c0_18 = arith.constant 0 : index
    %18 = vector.load %arg7[%c0_16, %c0_17, %c0_18] : memref<2x8x32xf32, #tpu.memory_space<vmem>>, vector<1x8x32xf32>
    %19 = vector.shape_cast %18 : vector<1x8x32xf32> to vector<8x32xf32>
    %c0_19 = arith.constant 0 : index
    %c0_20 = arith.constant 0 : index
    %c0_21 = arith.constant 0 : index
    %20 = vector.load %arg8[%c0_19, %c0_20, %c0_21] : memref<2x8x32xf32, #tpu.memory_space<vmem>>, vector<1x8x32xf32>
    %21 = vector.shape_cast %20 : vector<1x8x32xf32> to vector<8x32xf32>
    %c0_22 = arith.constant 0 : index
    %c0_23 = arith.constant 0 : index
    %c0_24 = arith.constant 0 : index
    %22 = vector.load %arg2[%c0_22, %c0_23, %c0_24] : memref<2x1x8xf32, #tpu.memory_space<vmem>>, vector<1x1x8xf32>
    %23 = vector.shape_cast %22 : vector<1x1x8xf32> to vector<1x8xf32>
    %c0_25 = arith.constant 0 : index
    %c0_26 = arith.constant 0 : index
    %c0_27 = arith.constant 0 : index
    %24 = vector.load %arg6[%c0_25, %c0_26, %c0_27] : memref<2x8x32xf32, #tpu.memory_space<vmem>>, vector<1x8x32xf32>
    %25 = vector.shape_cast %24 : vector<1x8x32xf32> to vector<8x32xf32>
    %26 = vector.extract_strided_slice %25 {offsets = [0, 0], sizes = [8, 8], strides = [1, 1]} : vector<8x32xf32> to vector<8x8xf32>
    %27 = vector.extract_strided_slice %19 {offsets = [0, 0], sizes = [8, 8], strides = [1, 1]} : vector<8x32xf32> to vector<8x8xf32>
    "tpu.trace_start"() <{level = 10 : i32, message = "qd,kd->qk"}> : () -> ()
    %cst_28 = arith.constant dense<0.000000e+00> : vector<8x8xf32>
    %28 = tpu.matmul %26, %27, %cst_28 {dimension_numbers = #tpu.dot_dimension_numbers<[1], [1], [0], [0], [0, 0, 1, 0], [], []>} : vector<8x8xf32>, vector<8x8xf32>, vector<8x8xf32> -> vector<8x8xf32>
    "tpu.trace_stop"() : () -> ()
    %29 = vector.broadcast %23 : vector<1x8xf32> to vector<8x8xf32>
    %30 = arith.addf %28, %29 : vector<8x8xf32>
    %cst_29 = arith.constant dense<0xFF800000> : vector<8xf32>
    %31 = vector.multi_reduction <maximumf>, %30, %cst_29 [1] : vector<8x8xf32> to vector<8xf32>
    %32 = vector.shape_cast %31 : vector<8xf32> to vector<8x1xf32>
    %33 = vector.broadcast %32 : vector<8x1xf32> to vector<8x8xf32>
    %34 = arith.subf %30, %33 : vector<8x8xf32>
    %35 = math.exp %34 : vector<8x8xf32>
    %cst_30 = arith.constant dense<0.000000e+00> : vector<8xf32>
    %36 = vector.multi_reduction <add>, %35, %cst_30 [1] : vector<8x8xf32> to vector<8xf32>
    %37 = vector.shape_cast %36 : vector<8xf32> to vector<8x1xf32>
    %38 = tpu.reciprocal %37 {approx = true} : vector<8x1xf32> -> vector<8x1xf32>
    %39 = vector.broadcast %38 : vector<8x1xf32> to vector<8x8xf32>
    %40 = arith.mulf %35, %39 : vector<8x8xf32>
    %41 = vector.extract_strided_slice %21 {offsets = [0, 0], sizes = [8, 8], strides = [1, 1]} : vector<8x32xf32> to vector<8x8xf32>
    %cst_31 = arith.constant dense<0.000000e+00> : vector<8x8xf32>
    %42 = tpu.matmul %40, %41, %cst_31 {dimension_numbers = #tpu.dot_dimension_numbers<[1], [0], [0], [1], [0, 0, 1, 1], [], []>} : vector<8x8xf32>, vector<8x8xf32>, vector<8x8xf32> -> vector<8x8xf32>
    %43 = vector.extract_strided_slice %25 {offsets = [0, 8], sizes = [8, 8], strides = [1, 1]} : vector<8x32xf32> to vector<8x8xf32>
    %44 = vector.extract_strided_slice %19 {offsets = [0, 8], sizes = [8, 8], strides = [1, 1]} : vector<8x32xf32> to vector<8x8xf32>
    "tpu.trace_start"() <{level = 10 : i32, message = "qd,kd->qk"}> : () -> ()
    %cst_32 = arith.constant dense<0.000000e+00> : vector<8x8xf32>
    %45 = tpu.matmul %43, %44, %cst_32 {dimension_numbers = #tpu.dot_dimension_numbers<[1], [1], [0], [0], [0, 0, 1, 0], [], []>} : vector<8x8xf32>, vector<8x8xf32>, vector<8x8xf32> -> vector<8x8xf32>
    "tpu.trace_stop"() : () -> ()
    %46 = vector.broadcast %23 : vector<1x8xf32> to vector<8x8xf32>
    %47 = arith.addf %45, %46 : vector<8x8xf32>
    %cst_33 = arith.constant dense<0xFF800000> : vector<8xf32>
    %48 = vector.multi_reduction <maximumf>, %47, %cst_33 [1] : vector<8x8xf32> to vector<8xf32>
    %49 = vector.shape_cast %48 : vector<8xf32> to vector<8x1xf32>
    %50 = vector.broadcast %49 : vector<8x1xf32> to vector<8x8xf32>
    %51 = arith.subf %47, %50 : vector<8x8xf32>
    %52 = math.exp %51 : vector<8x8xf32>
    %cst_34 = arith.constant dense<0.000000e+00> : vector<8xf32>
    %53 = vector.multi_reduction <add>, %52, %cst_34 [1] : vector<8x8xf32> to vector<8xf32>
    %54 = vector.shape_cast %53 : vector<8xf32> to vector<8x1xf32>
    %55 = tpu.reciprocal %54 {approx = true} : vector<8x1xf32> -> vector<8x1xf32>
    %56 = vector.broadcast %55 : vector<8x1xf32> to vector<8x8xf32>
    %57 = arith.mulf %52, %56 : vector<8x8xf32>
    %58 = vector.extract_strided_slice %21 {offsets = [0, 8], sizes = [8, 8], strides = [1, 1]} : vector<8x32xf32> to vector<8x8xf32>
    %cst_35 = arith.constant dense<0.000000e+00> : vector<8x8xf32>
    %59 = tpu.matmul %57, %58, %cst_35 {dimension_numbers = #tpu.dot_dimension_numbers<[1], [0], [0], [1], [0, 0, 1, 1], [], []>} : vector<8x8xf32>, vector<8x8xf32>, vector<8x8xf32> -> vector<8x8xf32>
    %60 = vector.extract_strided_slice %25 {offsets = [0, 16], sizes = [8, 8], strides = [1, 1]} : vector<8x32xf32> to vector<8x8xf32>
    %61 = vector.extract_strided_slice %19 {offsets = [0, 16], sizes = [8, 8], strides = [1, 1]} : vector<8x32xf32> to vector<8x8xf32>
    "tpu.trace_start"() <{level = 10 : i32, message = "qd,kd->qk"}> : () -> ()
    %cst_36 = arith.constant dense<0.000000e+00> : vector<8x8xf32>
    %62 = tpu.matmul %60, %61, %cst_36 {dimension_numbers = #tpu.dot_dimension_numbers<[1], [1], [0], [0], [0, 0, 1, 0], [], []>} : vector<8x8xf32>, vector<8x8xf32>, vector<8x8xf32> -> vector<8x8xf32>
    "tpu.trace_stop"() : () -> ()
    %63 = vector.broadcast %23 : vector<1x8xf32> to vector<8x8xf32>
    %64 = arith.addf %62, %63 : vector<8x8xf32>
    %cst_37 = arith.constant dense<0xFF800000> : vector<8xf32>
    %65 = vector.multi_reduction <maximumf>, %64, %cst_37 [1] : vector<8x8xf32> to vector<8xf32>
    %66 = vector.shape_cast %65 : vector<8xf32> to vector<8x1xf32>
    %67 = vector.broadcast %66 : vector<8x1xf32> to vector<8x8xf32>
    %68 = arith.subf %64, %67 : vector<8x8xf32>
    %69 = math.exp %68 : vector<8x8xf32>
    %cst_38 = arith.constant dense<0.000000e+00> : vector<8xf32>
    %70 = vector.multi_reduction <add>, %69, %cst_38 [1] : vector<8x8xf32> to vector<8xf32>
    %71 = vector.shape_cast %70 : vector<8xf32> to vector<8x1xf32>
    %72 = tpu.reciprocal %71 {approx = true} : vector<8x1xf32> -> vector<8x1xf32>
    %73 = vector.broadcast %72 : vector<8x1xf32> to vector<8x8xf32>
    %74 = arith.mulf %69, %73 : vector<8x8xf32>
    %75 = vector.extract_strided_slice %21 {offsets = [0, 16], sizes = [8, 8], strides = [1, 1]} : vector<8x32xf32> to vector<8x8xf32>
    %cst_39 = arith.constant dense<0.000000e+00> : vector<8x8xf32>
    %76 = tpu.matmul %74, %75, %cst_39 {dimension_numbers = #tpu.dot_dimension_numbers<[1], [0], [0], [1], [0, 0, 1, 1], [], []>} : vector<8x8xf32>, vector<8x8xf32>, vector<8x8xf32> -> vector<8x8xf32>
    %77 = vector.extract_strided_slice %25 {offsets = [0, 24], sizes = [8, 8], strides = [1, 1]} : vector<8x32xf32> to vector<8x8xf32>
    %78 = vector.extract_strided_slice %19 {offsets = [0, 24], sizes = [8, 8], strides = [1, 1]} : vector<8x32xf32> to vector<8x8xf32>
    "tpu.trace_start"() <{level = 10 : i32, message = "qd,kd->qk"}> : () -> ()
    %cst_40 = arith.constant dense<0.000000e+00> : vector<8x8xf32>
    %79 = tpu.matmul %77, %78, %cst_40 {dimension_numbers = #tpu.dot_dimension_numbers<[1], [1], [0], [0], [0, 0, 1, 0], [], []>} : vector<8x8xf32>, vector<8x8xf32>, vector<8x8xf32> -> vector<8x8xf32>
    "tpu.trace_stop"() : () -> ()
    %80 = vector.broadcast %23 : vector<1x8xf32> to vector<8x8xf32>
    %81 = arith.addf %79, %80 : vector<8x8xf32>
    %cst_41 = arith.constant dense<0xFF800000> : vector<8xf32>
    %82 = vector.multi_reduction <maximumf>, %81, %cst_41 [1] : vector<8x8xf32> to vector<8xf32>
    %83 = vector.shape_cast %82 : vector<8xf32> to vector<8x1xf32>
    %84 = vector.broadcast %83 : vector<8x1xf32> to vector<8x8xf32>
    %85 = arith.subf %81, %84 : vector<8x8xf32>
    %86 = math.exp %85 : vector<8x8xf32>
    %cst_42 = arith.constant dense<0.000000e+00> : vector<8xf32>
    %87 = vector.multi_reduction <add>, %86, %cst_42 [1] : vector<8x8xf32> to vector<8xf32>
    %88 = vector.shape_cast %87 : vector<8xf32> to vector<8x1xf32>
    %89 = tpu.reciprocal %88 {approx = true} : vector<8x1xf32> -> vector<8x1xf32>
    %90 = vector.broadcast %89 : vector<8x1xf32> to vector<8x8xf32>
    %91 = arith.mulf %86, %90 : vector<8x8xf32>
    %92 = vector.extract_strided_slice %21 {offsets = [0, 24], sizes = [8, 8], strides = [1, 1]} : vector<8x32xf32> to vector<8x8xf32>
    %cst_43 = arith.constant dense<0.000000e+00> : vector<8x8xf32>
    %93 = tpu.matmul %91, %92, %cst_43 {dimension_numbers = #tpu.dot_dimension_numbers<[1], [0], [0], [1], [0, 0, 1, 1], [], []>} : vector<8x8xf32>, vector<8x8xf32>, vector<8x8xf32> -> vector<8x8xf32>
    %94 = tpu.concatenate %42, %59, %76, %93 in 1 : vector<8x8xf32>, vector<8x8xf32>, vector<8x8xf32>, vector<8x8xf32> -> vector<8x32xf32>
    %c0_44 = arith.constant 0 : index
    %c0_45 = arith.constant 0 : index
    %c0_46 = arith.constant 0 : index
    %95 = vector.load %arg5[%c0_44, %c0_45, %c0_46] : memref<2x8x32xf32, #tpu.memory_space<vmem>>, vector<1x8x32xf32>
    %96 = vector.shape_cast %95 : vector<1x8x32xf32> to vector<8x32xf32>
    %97 = vector.shape_cast %94 : vector<8x32xf32> to vector<1x8x32xf32>
    tpu.vector_store %arg5[%c0_44, %c0_45, %c0_46], %97 {strides = array<i32>} : memref<2x8x32xf32, #tpu.memory_space<vmem>>, vector<1x8x32xf32>,
    %c1 = arith.constant 1 : index
    %c0_47 = arith.constant 0 : index
    %c0_48 = arith.constant 0 : index
    %98 = vector.load %arg7[%c1, %c0_47, %c0_48] : memref<2x8x32xf32, #tpu.memory_space<vmem>>, vector<1x8x32xf32>
    %99 = vector.shape_cast %98 : vector<1x8x32xf32> to vector<8x32xf32>
    %c1_49 = arith.constant 1 : index
    %c0_50 = arith.constant 0 : index
    %c0_51 = arith.constant 0 : index
    %100 = vector.load %arg8[%c1_49, %c0_50, %c0_51] : memref<2x8x32xf32, #tpu.memory_space<vmem>>, vector<1x8x32xf32>
    %101 = vector.shape_cast %100 : vector<1x8x32xf32> to vector<8x32xf32>
    %c1_52 = arith.constant 1 : index
    %c0_53 = arith.constant 0 : index
    %c0_54 = arith.constant 0 : index
    %102 = vector.load %arg2[%c1_52, %c0_53, %c0_54] : memref<2x1x8xf32, #tpu.memory_space<vmem>>, vector<1x1x8xf32>
    %103 = vector.shape_cast %102 : vector<1x1x8xf32> to vector<1x8xf32>
    %c1_55 = arith.constant 1 : index
    %c0_56 = arith.constant 0 : index
    %c0_57 = arith.constant 0 : index
    %104 = vector.load %arg6[%c1_55, %c0_56, %c0_57] : memref<2x8x32xf32, #tpu.memory_space<vmem>>, vector<1x8x32xf32>
    %105 = vector.shape_cast %104 : vector<1x8x32xf32> to vector<8x32xf32>
    %106 = vector.extract_strided_slice %105 {offsets = [0, 0], sizes = [8, 8], strides = [1, 1]} : vector<8x32xf32> to vector<8x8xf32>
    %107 = vector.extract_strided_slice %99 {offsets = [0, 0], sizes = [8, 8], strides = [1, 1]} : vector<8x32xf32> to vector<8x8xf32>
    "tpu.trace_start"() <{level = 10 : i32, message = "qd,kd->qk"}> : () -> ()
    %cst_58 = arith.constant dense<0.000000e+00> : vector<8x8xf32>
    %108 = tpu.matmul %106, %107, %cst_58 {dimension_numbers = #tpu.dot_dimension_numbers<[1], [1], [0], [0], [0, 0, 1, 0], [], []>} : vector<8x8xf32>, vector<8x8xf32>, vector<8x8xf32> -> vector<8x8xf32>
    "tpu.trace_stop"() : () -> ()
    %109 = vector.broadcast %103 : vector<1x8xf32> to vector<8x8xf32>
    %110 = arith.addf %108, %109 : vector<8x8xf32>
    %cst_59 = arith.constant dense<0xFF800000> : vector<8xf32>
    %111 = vector.multi_reduction <maximumf>, %110, %cst_59 [1] : vector<8x8xf32> to vector<8xf32>
    %112 = vector.shape_cast %111 : vector<8xf32> to vector<8x1xf32>
    %113 = vector.broadcast %112 : vector<8x1xf32> to vector<8x8xf32>
    %114 = arith.subf %110, %113 : vector<8x8xf32>
    %115 = math.exp %114 : vector<8x8xf32>
    %cst_60 = arith.constant dense<0.000000e+00> : vector<8xf32>
    %116 = vector.multi_reduction <add>, %115, %cst_60 [1] : vector<8x8xf32> to vector<8xf32>
    %117 = vector.shape_cast %116 : vector<8xf32> to vector<8x1xf32>
    %118 = tpu.reciprocal %117 {approx = true} : vector<8x1xf32> -> vector<8x1xf32>
    %119 = vector.broadcast %118 : vector<8x1xf32> to vector<8x8xf32>
    %120 = arith.mulf %115, %119 : vector<8x8xf32>
    %121 = vector.extract_strided_slice %101 {offsets = [0, 0], sizes = [8, 8], strides = [1, 1]} : vector<8x32xf32> to vector<8x8xf32>
    %cst_61 = arith.constant dense<0.000000e+00> : vector<8x8xf32>
    %122 = tpu.matmul %120, %121, %cst_61 {dimension_numbers = #tpu.dot_dimension_numbers<[1], [0], [0], [1], [0, 0, 1, 1], [], []>} : vector<8x8xf32>, vector<8x8xf32>, vector<8x8xf32> -> vector<8x8xf32>
    %123 = vector.extract_strided_slice %105 {offsets = [0, 8], sizes = [8, 8], strides = [1, 1]} : vector<8x32xf32> to vector<8x8xf32>
    %124 = vector.extract_strided_slice %99 {offsets = [0, 8], sizes = [8, 8], strides = [1, 1]} : vector<8x32xf32> to vector<8x8xf32>
    "tpu.trace_start"() <{level = 10 : i32, message = "qd,kd->qk"}> : () -> ()
    %cst_62 = arith.constant dense<0.000000e+00> : vector<8x8xf32>
    %125 = tpu.matmul %123, %124, %cst_62 {dimension_numbers = #tpu.dot_dimension_numbers<[1], [1], [0], [0], [0, 0, 1, 0], [], []>} : vector<8x8xf32>, vector<8x8xf32>, vector<8x8xf32> -> vector<8x8xf32>
    "tpu.trace_stop"() : () -> ()
    %126 = vector.broadcast %103 : vector<1x8xf32> to vector<8x8xf32>
    %127 = arith.addf %125, %126 : vector<8x8xf32>
    %cst_63 = arith.constant dense<0xFF800000> : vector<8xf32>
    %128 = vector.multi_reduction <maximumf>, %127, %cst_63 [1] : vector<8x8xf32> to vector<8xf32>
    %129 = vector.shape_cast %128 : vector<8xf32> to vector<8x1xf32>
    %130 = vector.broadcast %129 : vector<8x1xf32> to vector<8x8xf32>
    %131 = arith.subf %127, %130 : vector<8x8xf32>
    %132 = math.exp %131 : vector<8x8xf32>
    %cst_64 = arith.constant dense<0.000000e+00> : vector<8xf32>
    %133 = vector.multi_reduction <add>, %132, %cst_64 [1] : vector<8x8xf32> to vector<8xf32>
    %134 = vector.shape_cast %133 : vector<8xf32> to vector<8x1xf32>
    %135 = tpu.reciprocal %134 {approx = true} : vector<8x1xf32> -> vector<8x1xf32>
    %136 = vector.broadcast %135 : vector<8x1xf32> to vector<8x8xf32>
    %137 = arith.mulf %132, %136 : vector<8x8xf32>
    %138 = vector.extract_strided_slice %101 {offsets = [0, 8], sizes = [8, 8], strides = [1, 1]} : vector<8x32xf32> to vector<8x8xf32>
    %cst_65 = arith.constant dense<0.000000e+00> : vector<8x8xf32>
    %139 = tpu.matmul %137, %138, %cst_65 {dimension_numbers = #tpu.dot_dimension_numbers<[1], [0], [0], [1], [0, 0, 1, 1], [], []>} : vector<8x8xf32>, vector<8x8xf32>, vector<8x8xf32> -> vector<8x8xf32>
    %140 = vector.extract_strided_slice %105 {offsets = [0, 16], sizes = [8, 8], strides = [1, 1]} : vector<8x32xf32> to vector<8x8xf32>
    %141 = vector.extract_strided_slice %99 {offsets = [0, 16], sizes = [8, 8], strides = [1, 1]} : vector<8x32xf32> to vector<8x8xf32>
    "tpu.trace_start"() <{level = 10 : i32, message = "qd,kd->qk"}> : () -> ()
    %cst_66 = arith.constant dense<0.000000e+00> : vector<8x8xf32>
    %142 = tpu.matmul %140, %141, %cst_66 {dimension_numbers = #tpu.dot_dimension_numbers<[1], [1], [0], [0], [0, 0, 1, 0], [], []>} : vector<8x8xf32>, vector<8x8xf32>, vector<8x8xf32> -> vector<8x8xf32>
    "tpu.trace_stop"() : () -> ()
    %143 = vector.broadcast %103 : vector<1x8xf32> to vector<8x8xf32>
    %144 = arith.addf %142, %143 : vector<8x8xf32>
    %cst_67 = arith.constant dense<0xFF800000> : vector<8xf32>
    %145 = vector.multi_reduction <maximumf>, %144, %cst_67 [1] : vector<8x8xf32> to vector<8xf32>
    %146 = vector.shape_cast %145 : vector<8xf32> to vector<8x1xf32>
    %147 = vector.broadcast %146 : vector<8x1xf32> to vector<8x8xf32>
    %148 = arith.subf %144, %147 : vector<8x8xf32>
    %149 = math.exp %148 : vector<8x8xf32>
    %cst_68 = arith.constant dense<0.000000e+00> : vector<8xf32>
    %150 = vector.multi_reduction <add>, %149, %cst_68 [1] : vector<8x8xf32> to vector<8xf32>
    %151 = vector.shape_cast %150 : vector<8xf32> to vector<8x1xf32>
    %152 = tpu.reciprocal %151 {approx = true} : vector<8x1xf32> -> vector<8x1xf32>
    %153 = vector.broadcast %152 : vector<8x1xf32> to vector<8x8xf32>
    %154 = arith.mulf %149, %153 : vector<8x8xf32>
    %155 = vector.extract_strided_slice %101 {offsets = [0, 16], sizes = [8, 8], strides = [1, 1]} : vector<8x32xf32> to vector<8x8xf32>
    %cst_69 = arith.constant dense<0.000000e+00> : vector<8x8xf32>
    %156 = tpu.matmul %154, %155, %cst_69 {dimension_numbers = #tpu.dot_dimension_numbers<[1], [0], [0], [1], [0, 0, 1, 1], [], []>} : vector<8x8xf32>, vector<8x8xf32>, vector<8x8xf32> -> vector<8x8xf32>
    %157 = vector.extract_strided_slice %105 {offsets = [0, 24], sizes = [8, 8], strides = [1, 1]} : vector<8x32xf32> to vector<8x8xf32>
    %158 = vector.extract_strided_slice %99 {offsets = [0, 24], sizes = [8, 8], strides = [1, 1]} : vector<8x32xf32> to vector<8x8xf32>
    "tpu.trace_start"() <{level = 10 : i32, message = "qd,kd->qk"}> : () -> ()
    %cst_70 = arith.constant dense<0.000000e+00> : vector<8x8xf32>
    %159 = tpu.matmul %157, %158, %cst_70 {dimension_numbers = #tpu.dot_dimension_numbers<[1], [1], [0], [0], [0, 0, 1, 0], [], []>} : vector<8x8xf32>, vector<8x8xf32>, vector<8x8xf32> -> vector<8x8xf32>
    "tpu.trace_stop"() : () -> ()
    %160 = vector.broadcast %103 : vector<1x8xf32> to vector<8x8xf32>
    %161 = arith.addf %159, %160 : vector<8x8xf32>
    %cst_71 = arith.constant dense<0xFF800000> : vector<8xf32>
    %162 = vector.multi_reduction <maximumf>, %161, %cst_71 [1] : vector<8x8xf32> to vector<8xf32>
    %163 = vector.shape_cast %162 : vector<8xf32> to vector<8x1xf32>
    %164 = vector.broadcast %163 : vector<8x1xf32> to vector<8x8xf32>
    %165 = arith.subf %161, %164 : vector<8x8xf32>
    %166 = math.exp %165 : vector<8x8xf32>
    %cst_72 = arith.constant dense<0.000000e+00> : vector<8xf32>
    %167 = vector.multi_reduction <add>, %166, %cst_72 [1] : vector<8x8xf32> to vector<8xf32>
    %168 = vector.shape_cast %167 : vector<8xf32> to vector<8x1xf32>
    %169 = tpu.reciprocal %168 {approx = true} : vector<8x1xf32> -> vector<8x1xf32>
    %170 = vector.broadcast %169 : vector<8x1xf32> to vector<8x8xf32>
    %171 = arith.mulf %166, %170 : vector<8x8xf32>
    %172 = vector.extract_strided_slice %101 {offsets = [0, 24], sizes = [8, 8], strides = [1, 1]} : vector<8x32xf32> to vector<8x8xf32>
    %cst_73 = arith.constant dense<0.000000e+00> : vector<8x8xf32>
    %173 = tpu.matmul %171, %172, %cst_73 {dimension_numbers = #tpu.dot_dimension_numbers<[1], [0], [0], [1], [0, 0, 1, 1], [], []>} : vector<8x8xf32>, vector<8x8xf32>, vector<8x8xf32> -> vector<8x8xf32>
    %174 = tpu.concatenate %122, %139, %156, %173 in 1 : vector<8x8xf32>, vector<8x8xf32>, vector<8x8xf32>, vector<8x8xf32> -> vector<8x32xf32>
    %c1_74 = arith.constant 1 : index
    %c0_75 = arith.constant 0 : index
    %c0_76 = arith.constant 0 : index
    %175 = vector.load %arg5[%c1_74, %c0_75, %c0_76] : memref<2x8x32xf32, #tpu.memory_space<vmem>>, vector<1x8x32xf32>
    %176 = vector.shape_cast %175 : vector<1x8x32xf32> to vector<8x32xf32>
    %177 = vector.shape_cast %174 : vector<8x32xf32> to vector<1x8x32xf32>
    tpu.vector_store %arg5[%c1_74, %c0_75, %c0_76], %177 {strides = array<i32>} : memref<2x8x32xf32, #tpu.memory_space<vmem>>, vector<1x8x32xf32>,
    return
  }
  func.func @transform_0(%arg0: i32) -> (i32, i32, i32) {
    %c0_i32 = arith.constant 0 : i32
    %c0_i32_0 = arith.constant 0 : i32
    %c0_i32_1 = arith.constant 0 : i32
    return %arg0, %c0_i32, %c0_i32_0 : i32, i32, i32
  }
  func.func @transform_1(%arg0: i32) -> (i32, i32, i32) {
    %c0_i32 = arith.constant 0 : i32
    %c0_i32_0 = arith.constant 0 : i32
    %c0_i32_1 = arith.constant 0 : i32
    return %arg0, %c0_i32, %c0_i32_0 : i32, i32, i32
  }
  func.func @transform_2(%arg0: i32) -> (i32, i32) {
    %c0_i32 = arith.constant 0 : i32
    %c0_i32_0 = arith.constant 0 : i32
    %c0_i32_1 = arith.constant 0 : i32
    return %c0_i32, %c0_i32_0 : i32, i32
  }
  func.func @transform_3(%arg0: i32) -> (i32, i32) {
    %c0_i32 = arith.constant 0 : i32
    %c0_i32_0 = arith.constant 0 : i32
    %c0_i32_1 = arith.constant 0 : i32
    return %c0_i32, %c0_i32_0 : i32, i32
  }
  func.func @transform_4(%arg0: i32) -> (i32, i32, i32) {
    %c0_i32 = arith.constant 0 : i32
    %c0_i32_0 = arith.constant 0 : i32
    %c0_i32_1 = arith.constant 0 : i32
    return %arg0, %c0_i32, %c0_i32_0 : i32, i32, i32
  }
}

</mosaic_0001>

<bundles_post_ra>
// kernel: tpu_custom_call.1
= control target key start
LH: loop header
LB: loop body
LE: loop exit
PB: predicated region body
PF: predicated region fallthrough
CT: control target
= control target key end

     0   :  { %9 = vsyncpa [#allocation6], 0  ;;  %s2082_s0 = inlined_call_operand.hbm [shape: f32[2,8,32], index: 0, kind: input, shape index: {}]   ;;  %s2083_s1 = inlined_call_operand.hbm [shape: f32[2,1,8], index: 1, kind: input, shape index: {}]   ;;  %s2084_s2 = inlined_call_operand.hbm [shape: f32[32,96], index: 2, kind: input, shape index: {}]   ;;  %s2085_s3 = inlined_call_operand.vmem [shape: f32[1,96], index: 3, kind: input, shape index: {}]   ;;  %s2086_s4 = inlined_call_operand.hbm [shape: f32[2,8,32], index: 4, kind: output, shape index: {}]  }
   0x1   :  { %10 = vsyncpa [#allocation9], 0 }
   0x2   :  { %11 = vsyncpa [#allocation7], 0  ;;  %s1858_s15 = smov [#allocation8]  }
   0x3   :  { %s29_s16 = sshll.u32 %s1858_s15, 4  ;;  %s30_s16 = int_to_ptr.vmem [resolvable:$true] %s29_s16 }
   0x4   :  { %s1780_s17 = scalar_lea.vmem %s30_s16, 32  ;;  %p1785_p1 = scmp.lt.s32.totalorder %s30_s16, %s30_s16 }
   0x5   :  { %p1781_p0 = scmp.ne.s32.totalorder %s30_s16, %s1780_s17  ;;  %p1786_p2 = scmp.lt.s32.totalorder %s1780_s17, %s1780_s17 }
   0x7   :  { %p1787_p3 = por %p1786_p2, %p1785_p1 }
   0x9   :  { %p1788_p4 = pnand %p1787_p3, %p1781_p0 }
   0xb   :  { %1791 = shalt.err (!%p1788_p4)
}
   0xc   :  { %s1859_s18 = smov 16   ;;  %s1860_s19 = smov 1  }
   0xd   :  { %35 = dma.hbm_to_vmem [thread:$0]  %s2083_s1, 32, %s30_s16, [#allocation9], %s1859_s18, %s1859_s18, %s1860_s19  }
   0xe   :  { %s1861_s22 = smov [#allocation5]  }
   0xf   :  { %s17_s23 = sshll.u32 %s1861_s22, 4  ;;  %s18_s23 = int_to_ptr.vmem [resolvable:$true] %s17_s23 }
  0x10   :  { %s1800_s24 = scalar_lea.vmem %s18_s23, 256  ;;  %p1805_p6 = scmp.lt.s32.totalorder %s18_s23, %s18_s23 }
  0x11   :  { %p1801_p5 = scmp.ne.s32.totalorder %s18_s23, %s1800_s24  ;;  %p1806_p7 = scmp.lt.s32.totalorder %s1800_s24, %s1800_s24 }
  0x13   :  { %p1807_p8 = por %p1806_p7, %p1805_p6 }
  0x15   :  { %p1808_p9 = pnand %p1807_p8, %p1801_p5 }
  0x17   :  { %1811 = shalt.err (!%p1808_p9)
}
  0x18   :  { %s1862_s25 = smov 128   ;;  %s1863_s26 = smov 8  }
  0x19   :  { %23 = dma.hbm_to_vmem [thread:$0]  %s2082_s0, 256, %s18_s23, [#allocation6], %s1862_s25, %s1862_s25, %s1863_s26  }
  0x1a   :  { %s1864_s1 = smov [#allocation10]  }
  0x1b   :  { %s41_s29 = sshll.u32 %s1864_s1, 4  ;;  %s42_s29 = int_to_ptr.vmem [resolvable:$true] %s41_s29 }
  0x1c   :  { %s1820_s30 = scalar_lea.vmem %s42_s29, 512  ;;  %p1825_p11 = scmp.lt.s32.totalorder %s42_s29, %s42_s29 }
  0x1d   :  { %p1821_p10 = scmp.ne.s32.totalorder %s42_s29, %s1820_s30  ;;  %p1826_p12 = scmp.lt.s32.totalorder %s1820_s30, %s1820_s30 }
  0x1f   :  { %p1827_p13 = por %p1826_p12, %p1825_p11 }
  0x21   :  { %p1828_p0 = pnand %p1827_p13, %p1821_p10 }
  0x23   :  { %1831 = shalt.err (!%p1828_p0)
}
  0x24   :  { %47 = dma.hbm_to_vmem [thread:$0]  %s2084_s2, 512, %s42_s29, [#allocation9], %s1862_s25, %s1862_s25, %s1863_s26  }
  0x25   :  { %1852 = dma.done.wait [#allocation6], 256  }
  0x26   :  { %1853 = vsyncadd [#allocation6], 4294967040 }
  0x27   :  { %1854 = dma.done.wait [#allocation9], 544  }
  0x28   :  { %1855 = vsyncadd [#allocation9], 4294966752  ;;  %vm72_vm0 = vcmask 261120   ;;  %v64_v0 = vld [vmem:[#allocation10 + $0x18] sm:$0xff]  ;;  %v63_v1 = vld [vmem:[#allocation10 + $0x10] sm:$0xff]  ;;  %v1865_v6 = vmov 0.0  }
  0x29   :  { %1633 = vmatprep.subr.mxu0 %v64_v0  ;;  %v59_v2 = vld [vmem:[#allocation5] sm:$0xff]  ;;  %v61_v4 = vld [vmem:[#allocation10] sm:$0xff]  ;;  %v60_v5 = vld [vmem:[#allocation5 + $0x8] sm:$0xff]  ;;  %1644 = vmatprep.subr.mxu1 %v1865_v6  ;;  %vm1866_vm1 = vmmov 0   ;;  %s1867_s7 = smov 96   ;;  %vm186_vm2 = vcmask 64512  }
  0x2a   :  { %1634 = vmatpush3.msra.mxu0 %v64_v0  ;;  %v62_v3 = vld [vmem:[#allocation10 + $0x8] sm:$0xff]  ;;  %1641 = vmatprep.mubr.msk.f32.mxu0 %vm72_vm0, %v59_v2  ;;  %v1566_v7 = vld [vmem:[%s2085_s3] ss:$0 sm:$0xff]  ;;  %s1868_s3 = smov 112   ;;  %s1869_s8 = smov 120   ;;  %vm856_vm3 = vcmask 130048  }
  0x2b   :  { %1635 = vmatprep.subr.mxu0 %v63_v1  ;;  %1646 = vmatprep.mubr.msk.f32.mxu1 %vm1866_vm1, %v1865_v6  ;;  %s1870_s9 = smov 104   ;;  %s1871_s10 = smov 64   ;;  %v1569_v34 = vld [vmem:[#allocation8] ss:$0 sm:$0xff]  ;;  %v1582_v50 = vld [vmem:[#allocation8 + $0x1] ss:$0 sm:$0xff] }
  0x2c   :  { %1636 = vmatpush3.msra.mxu0 %v63_v1  ;;  %s1872_s11 = smov 24   ;;  %vm858_vm4 = vcmask 195584   ;;  %s1873_s12 = smov [#allocation11]  }
  0x2d   :  { %1637 = vmatprep.subr.mxu0 %v62_v3  ;;  %s1553_s13 = sshll.u32 %s1873_s12, 4  ;;  %s1554_s13 = int_to_ptr.vmem [resolvable:$true] %s1553_s13 }
  0x2e   :  { %1638 = vmatpush3.msra.mxu0 %v62_v3  ;;  %s1832_s14 = scalar_lea.vmem %s1554_s13, 256  ;;  %p1837_p2 = scmp.lt.s32.totalorder %s1554_s13, %s1554_s13 }
  0x2f   :  { %1639 = vmatprep.subr.mxu0 %v61_v4  ;;  %p1833_p1 = scmp.ne.s32.totalorder %s1554_s13, %s1832_s14  ;;  %p1838_p3 = scmp.lt.s32.totalorder %s1832_s14, %s1832_s14 }
  0x30   :  { %1640 = vmatpush3.msra.mxu0 %v61_v4 }
  0x31   :  { %1642 = vmatmul.mubr.msk.f32.vlgmr.msra.gmra.mxu0 %vm72_vm0, %v60_v5  ;;  %1654 = vmatprep.subr.mxu0 %v1865_v6  ;;  %p1839_p4 = por %p1838_p3, %p1837_p2 }
  0x32   :  { %1656 = vmatprep.mubr.msk.f32.mxu0 %vm1866_vm1, %v1865_v6 }
  0x33   :  { %p1840_p5 = pnand %p1839_p4, %p1833_p1 }
  0xf1   :  { %v1643_v8 = vpop.f32.mrf.mxu0 }
  0xf2   :  { %v1923_v9 = vadd.f32 %v1643_v8, %v1566_v7 }
  0xf3   :  { %v145_v10 = vpop.f32.mrf.mxu0 }
  0xf4   :  { %v155_v11 = vmul.f32 0.35355338, %v1923_v9  ;;  %v146_v12 = vadd.f32 %v1566_v7, %v145_v10 }
  0xf6   :  { %157 = vst.msk [vmem:[#allocation2 + $0x8] sm:$0xff] %vm72_vm0, %v155_v11  ;;  %v154_v13 = vmul.f32 0.35355338, %v146_v12  ;;  %160 = vrot.lane.b32.xlu0 %v146_v12, %s1867_s7 }
  0xf8   :  { %156 = vst.msk [vmem:[#allocation2] sm:$0xff] %vm72_vm0, %v154_v13 }
  0xfa   :  { %162 = vrot.lane.b32.xlu0 %v1923_v9, %s1867_s7 }
  0xfd   :  { %v868_v19 = vld [vmem:[#allocation2 + $0x8] sm:$0xff] }
  0xff   :  { %v179_v17 = vld [vmem:[#allocation2] sm:$0xff] }
 0x168   :  { %v161_v14 = vpop.permute.xlu0 %160 }
 0x169   :  { %166 = vst.msk [vmem:[#allocation3] sm:$0xff] %vm72_vm0, %v161_v14 }
 0x16c   :  { %v163_v15 = vpop.permute.xlu0 %162 }
 0x16d   :  { %167 = vst.msk [vmem:[#allocation3 + $0x8] sm:$0xff] %vm72_vm0, %v163_v15 }
 0x170   :  { %v176_v16 = vld [vmem:[#allocation3] sm:$0xff] }
 0x171   :  { %515 = vrot.lane.b32.xlu0 %v176_v16, %s1868_s3  ;;  %349 = vrot.lane.b32.xlu1 %v176_v16, %s1869_s8 }
 0x172   :  { %1645 = vmatpush3.xpose.msk.msra.mxu1 %vm186_vm2, %v176_v16 }
 0x173   :  { %1649 = vmatprep.subr.mxu1 %v1865_v6 }
 0x174   :  { %v862_v18 = vld [vmem:[#allocation3 + $0x8] sm:$0xff] }
 0x175   :  { %1647 = vmatmul.mubr.msk.f32.vlgmr.msra.gmra.mxu1 %vm186_vm2, %v179_v17  ;;  %680 = vrot.lane.b32.xlu0 %v176_v16, %s1870_s9 }
 0x176   :  { %347 = vrot.lane.b32.xlu1 %v179_v17, %s1869_s8  ;;  %1651 = vmatprep.mubr.msk.f32.mxu1 %vm1866_vm1, %v1865_v6 }
 0x179   :  { %1037 = vrot.lane.b32.xlu0 %v862_v18, %s1869_s8 }
 0x17a   :  { %513 = vrot.lane.b32.xlu1 %v179_v17, %s1868_s3 }
 0x17d   :  { %1203 = vrot.lane.b32.xlu0 %v862_v18, %s1868_s3 }
 0x17e   :  { %678 = vrot.lane.b32.xlu1 %v179_v17, %s1870_s9 }
 0x181   :  { %1368 = vrot.lane.b32.xlu0 %v862_v18, %s1870_s9 }
 0x182   :  { %1035 = vrot.lane.b32.xlu1 %v868_v19, %s1869_s8 }
 0x186   :  { %1201 = vrot.lane.b32.xlu1 %v868_v19, %s1868_s3 }
 0x18a   :  { %1366 = vrot.lane.b32.xlu1 %v868_v19, %s1870_s9 }
 0x18e   :  { %168 = vrot.lane.b32.xlu1 %v146_v12, %s1871_s10 }
 0x1e3   :  { %v350_v20 = vpop.permute.xlu1 %349  ;;  %v516_v21 = vpop.permute.xlu0 %515 }
 0x1e4   :  { %1655 = vmatpush3.xpose.msk.msra.mxu0 %vm186_vm2, %v350_v20 }
 0x1e5   :  { %1664 = vmatprep.subr.mxu0 %v1865_v6 }
 0x1e7   :  { %v681_v23 = vpop.permute.xlu0 %680 }
 0x1e8   :  { %v348_v22 = vpop.permute.xlu1 %347 }
 0x1e9   :  { %1657 = vmatmul.mubr.msk.f32.vlgmr.msra.gmra.mxu0 %vm186_vm2, %v348_v22 }
 0x1ea   :  { %1665 = vmatpush3.xpose.msk.msra.mxu0 %vm186_vm2, %v516_v21  ;;  %1666 = vmatprep.mubr.msk.f32.mxu0 %vm1866_vm1, %v1865_v6 }
 0x1eb   :  { %1674 = vmatprep.subr.mxu0 %v1865_v6  ;;  %v1038_v26 = vpop.permute.xlu0 %1037 }
 0x1ec   :  { %v514_v24 = vpop.permute.xlu1 %513 }
 0x1ed   :  { %1667 = vmatmul.mubr.msk.f32.vlgmr.msra.gmra.mxu0 %vm186_vm2, %v514_v24 }
 0x1ee   :  { %1675 = vmatpush3.xpose.msk.msra.mxu0 %vm186_vm2, %v681_v23  ;;  %1676 = vmatprep.mubr.msk.f32.mxu0 %vm1866_vm1, %v1865_v6 }
 0x1ef   :  { %1684 = vmatprep.subr.mxu0 %v1865_v6  ;;  %v1204_v28 = vpop.permute.xlu0 %1203 }
 0x1f0   :  { %v679_v25 = vpop.permute.xlu1 %678 }
 0x1f1   :  { %1677 = vmatmul.mubr.msk.f32.vlgmr.msra.gmra.mxu0 %vm186_vm2, %v679_v25 }
 0x1f2   :  { %1685 = vmatpush3.xpose.msk.msra.mxu0 %vm186_vm2, %v862_v18  ;;  %1686 = vmatprep.mubr.msk.f32.mxu0 %vm1866_vm1, %v1865_v6 }
 0x1f3   :  { %1694 = vmatprep.subr.mxu0 %v1865_v6  ;;  %v1369_v31 = vpop.permute.xlu0 %1368 }
 0x1f4   :  { %v1036_v27 = vpop.permute.xlu1 %1035 }
 0x1f5   :  { %1687 = vmatmul.mubr.msk.f32.vlgmr.msra.gmra.mxu0 %vm186_vm2, %v868_v19 }
 0x1f6   :  { %1695 = vmatpush3.xpose.msk.msra.mxu0 %vm186_vm2, %v1038_v26  ;;  %1696 = vmatprep.mubr.msk.f32.mxu0 %vm1866_vm1, %v1865_v6 }
 0x1f7   :  { %1704 = vmatprep.subr.mxu0 %v1865_v6 }
 0x1f8   :  { %v1202_v29 = vpop.permute.xlu1 %1201 }
 0x1f9   :  { %1697 = vmatmul.mubr.msk.f32.vlgmr.msra.gmra.mxu0 %vm186_vm2, %v1036_v27 }
 0x1fa   :  { %1705 = vmatpush3.xpose.msk.msra.mxu0 %vm186_vm2, %v1204_v28  ;;  %1706 = vmatprep.mubr.msk.f32.mxu0 %vm1866_vm1, %v1865_v6 }
 0x1fb   :  { %1714 = vmatprep.subr.mxu0 %v1865_v6 }
 0x1fc   :  { %v1367_v30 = vpop.permute.xlu1 %1366 }
 0x1fd   :  { %1707 = vmatmul.mubr.msk.f32.vlgmr.msra.gmra.mxu0 %vm186_vm2, %v1202_v29 }
 0x1fe   :  { %1715 = vmatpush3.xpose.msk.msra.mxu0 %vm186_vm2, %v1369_v31  ;;  %1716 = vmatprep.mubr.msk.f32.mxu0 %vm1866_vm1, %v1865_v6 }
 0x200   :  { %v169_v32 = vpop.permute.xlu1 %168 }
 0x201   :  { %174 = vst.msk [vmem:[#allocation4] sm:$0xff] %vm72_vm0, %v169_v32  ;;  %1717 = vmatmul.mubr.msk.f32.vlgmr.msra.gmra.mxu0 %vm186_vm2, %v1367_v30 }
 0x208   :  { %v1986_v33 = vld [vmem:[#allocation4] sm:$0xff] }
 0x209   :  { %1650 = vmatpush3.msra.mxu1 %v1986_v33 }
 0x20a   :  { %1659 = vmatprep.subr.mxu1 %v1865_v6 }
 0x235   :  { %v259_v35 = vpop.f32.mrf.mxu1 }
 0x236   :  { %v260_v36 = vadd.f32 %v1569_v34, %v259_v35 }
 0x237   :  { %v1648_v37 = vpop.f32.mrf.mxu1 }
 0x238   :  { %v263_v38 = vsel %vm186_vm2, %v260_v36, -inf }
 0x239   :  { %264 = vmax.xlane.f32.xlu0 %v263_v38 }
 0x2a9   :  { %v421_v39 = vpop.f32.mrf.mxu0 }
 0x2aa   :  { %v422_v40 = vadd.f32 %v1569_v34, %v421_v39 }
 0x2ab   :  { %v1658_v41 = vpop.f32.mrf.mxu0 }
 0x2ac   :  { %v425_v42 = vsel %vm186_vm2, %v422_v40, -inf }
 0x2ad   :  { %426 = vmax.xlane.f32.xlu1 %v425_v42  ;;  %v587_v43 = vpop.f32.mrf.mxu0 }
 0x2ae   :  { %v588_v44 = vadd.f32 %v1569_v34, %v587_v43 }
 0x2af   :  { %v1668_v45 = vpop.f32.mrf.mxu0 }
 0x2b0   :  { %v591_v46 = vsel %vm186_vm2, %v588_v44, -inf }
 0x2b1   :  { %v752_v47 = vpop.f32.mrf.mxu0  ;;  %592 = vmax.xlane.f32.xlu0 %v591_v46 }
 0x2b2   :  { %v753_v48 = vadd.f32 %v1569_v34, %v752_v47 }
 0x2b3   :  { %v1678_v49 = vpop.f32.mrf.mxu0 }
 0x2b4   :  { %v756_v51 = vsel %vm186_vm2, %v753_v48, -inf }
 0x2b5   :  { %v947_v52 = vpop.f32.mrf.mxu0  ;;  %757 = vmax.xlane.f32.xlu0 %v756_v51 }
 0x2b6   :  { %v948_v53 = vadd.f32 %v1582_v50, %v947_v52 }
 0x2b7   :  { %v1688_v54 = vpop.f32.mrf.mxu0 }
 0x2b8   :  { %v951_v55 = vsel %vm186_vm2, %v948_v53, -inf }
 0x2b9   :  { %952 = vmax.xlane.f32.xlu1 %v951_v55  ;;  %v1109_v56 = vpop.f32.mrf.mxu0 }
 0x2ba   :  { %v1110_v57 = vadd.f32 %v1582_v50, %v1109_v56 }
 0x2bb   :  { %v1698_v58 = vpop.f32.mrf.mxu0 }
 0x2bc   :  { %v1113_v59 = vsel %vm186_vm2, %v1110_v57, -inf }
 0x2bd   :  { %v1275_v60 = vpop.f32.mrf.mxu0  ;;  %1114 = vmax.xlane.f32.xlu0 %v1113_v59 }
 0x2be   :  { %v1276_v61 = vadd.f32 %v1582_v50, %v1275_v60 }
 0x2bf   :  { %v1708_v62 = vpop.f32.mrf.mxu0 }
 0x2c0   :  { %v1279_v63 = vsel %vm186_vm2, %v1276_v61, -inf }
 0x2c1   :  { %1280 = vmax.xlane.f32.xlu1 %v1279_v63  ;;  %v1440_v0 = vpop.f32.mrf.mxu0 }
 0x2c2   :  { %v1441_v1 = vadd.f32 %v1582_v50, %v1440_v0  ;;  %v265_v4 = vpop.xlane.xlu0 %264 }
 0x2c3   :  { %v1718_v2 = vpop.f32.mrf.mxu0  ;;  %v266_v5 = vsub.f32 %v260_v36, %v265_v4 }
 0x2c4   :  { %v1444_v3 = vsel %vm186_vm2, %v1441_v1, -inf }
 0x2c5   :  { %1445 = vmax.xlane.f32.xlu0 %v1444_v3  ;;  %v267_v7 = vmul.f32 1.442695, %v266_v5 }
 0x2c7   :  { %1740 = vpow2.f32 %v267_v7 }
 0x2d2   :  { %437 = vrot.lane.b32.xlu1 %v1986_v33, %s1869_s8 }
 0x2d4   :  { %v1741_v8 = vpop.eup %1740 }
 0x2d5   :  { %v269_v10 = vsel %vm186_vm2, %v1741_v8, 0.0 }
 0x2db   :  { %170 = vrot.lane.b32.xlu0 %v1923_v9, %s1871_s10 }
 0x2f6   :  { %270 = vadd.xlane.f32.xlu1 %v269_v10 }
 0x307   :  { %767 = vrot.lane.b32.xlu1 %v1986_v33, %s1870_s9 }
 0x336   :  { %v427_v11 = vpop.xlane.xlu1 %426 }
 0x337   :  { %v428_v12 = vsub.f32 %v422_v40, %v427_v11 }
 0x339   :  { %v429_v13 = vmul.f32 1.442695, %v428_v12 }
 0x33a   :  { %v593_v14 = vpop.xlane.xlu0 %592 }
 0x33b   :  { %1742 = vpow2.f32 %v429_v13  ;;  %v594_v15 = vsub.f32 %v588_v44, %v593_v14 }
 0x33d   :  { %v595_v16 = vmul.f32 1.442695, %v594_v15 }
 0x33e   :  { %v758_v17 = vpop.xlane.xlu0 %757 }
 0x33f   :  { %1744 = vpow2.f32 %v595_v16  ;;  %v759_v25 = vsub.f32 %v753_v48, %v758_v17 }
 0x341   :  { %v760_v28 = vmul.f32 1.442695, %v759_v25 }
 0x342   :  { %v953_v26 = vpop.xlane.xlu1 %952 }
 0x343   :  { %v954_v27 = vsub.f32 %v948_v53, %v953_v26  ;;  %1746 = vpow2.f32 %v760_v28 }
 0x345   :  { %v955_v31 = vmul.f32 1.442695, %v954_v27 }
 0x346   :  { %v1115_v19 = vpop.xlane.xlu0 %1114 }
 0x347   :  { %v1116_v29 = vsub.f32 %v1110_v57, %v1115_v19  ;;  %1748 = vpow2.f32 %v955_v31 }
 0x348   :  { %v1743_v9 = vpop.eup %1742 }
 0x349   :  { %v431_v18 = vsel %vm186_vm2, %v1743_v9, 0.0  ;;  %v1117_v34 = vmul.f32 1.442695, %v1116_v29 }
 0x34a   :  { %432 = vadd.xlane.f32.xlu0 %v431_v18  ;;  %v1281_v30 = vpop.xlane.xlu1 %1280 }
 0x34b   :  { %v1282_v32 = vsub.f32 %v1276_v61, %v1281_v30  ;;  %1750 = vpow2.f32 %v1117_v34 }
 0x34c   :  { %v2006_v20 = vpop.eup %1744 }
 0x34d   :  { %v597_v21 = vsel %vm186_vm2, %v2006_v20, 0.0  ;;  %v1283_v36 = vmul.f32 1.442695, %v1282_v32 }
 0x34e   :  { %598 = vadd.xlane.f32.xlu1 %v597_v21  ;;  %v1446_v22 = vpop.xlane.xlu0 %1445  ;;  %v438_v39 = vpop.permute.xlu1 %437 }
 0x34f   :  { %v1447_v35 = vsub.f32 %v1441_v1, %v1446_v22  ;;  %1752 = vpow2.f32 %v1283_v36 }
 0x350   :  { %v1747_v38 = vpop.eup %1746 }
 0x351   :  { %v1448_v37 = vmul.f32 1.442695, %v1447_v35  ;;  %v762_v40 = vsel %vm186_vm2, %v1747_v38, 0.0 }
 0x352   :  { %v171_v23 = vpop.permute.xlu0 %170 }
 0x353   :  { %175 = vst.msk [vmem:[#allocation4 + $0x8] sm:$0xff] %vm72_vm0, %v171_v23  ;;  %1754 = vpow2.f32 %v1448_v37 }
 0x35a   :  { %v2011_v24 = vld [vmem:[#allocation4 + $0x8] sm:$0xff] }
 0x35f   :  { %1125 = vrot.lane.b32.xlu1 %v2011_v24, %s1869_s8 }
 0x360   :  { %602 = vrot.lane.b32.xlu0 %v1986_v33, %s1868_s3  ;;  %v1749_v33 = vpop.eup %1748 }
 0x361   :  { %v2018_v41 = vpop.eup %1750  ;;  %v957_v45 = vsel %vm186_vm2, %v1749_v33, 0.0 }
 0x362   :  { %v2020_v43 = vpop.eup %1752  ;;  %v1119_v44 = vsel %vm186_vm2, %v2018_v41, 0.0 }
 0x363   :  { %v2025_v46 = vpop.eup %1754  ;;  %v1285_v48 = vsel %vm186_vm2, %v2020_v43, 0.0 }
 0x364   :  { %v1450_v47 = vsel %vm186_vm2, %v2025_v46, 0.0 }
 0x37f   :  { %v271_v42 = vpop.xlane.xlu1 %270  ;;  %763 = vadd.xlane.f32.xlu0 %v762_v40 }
 0x380   :  { %1756 = vrcp.f32 %v271_v42 }
 0x383   :  { %1120 = vadd.xlane.f32.xlu0 %v1119_v44  ;;  %958 = vadd.xlane.f32.xlu1 %v957_v45  ;;  %v768_v51 = vpop.permute.xlu1 %767 }
 0x387   :  { %1451 = vadd.xlane.f32.xlu0 %v1450_v47  ;;  %1286 = vadd.xlane.f32.xlu1 %v1285_v48 }
 0x38d   :  { %v1757_v49 = vpop.eup %1756 }
 0x38e   :  { %v273_v50 = vmul.f32 %v1757_v49, %v1741_v8 }
 0x390   :  { %1652 = vmatmul.mubr.msk.f32.vlgmr.msra.gmra.mxu1 %vm186_vm2, %v273_v50 }
 0x391   :  { %1660 = vmatpush3.msra.mxu1 %v438_v39  ;;  %1661 = vmatprep.mubr.msk.f32.mxu1 %vm1866_vm1, %v1865_v6 }
 0x392   :  { %1669 = vmatprep.subr.mxu1 %v1865_v6 }
 0x398   :  { %1455 = vrot.lane.b32.xlu1 %v2011_v24, %s1870_s9 }
 0x39d   :  { %1290 = vrot.lane.b32.xlu0 %v2011_v24, %s1868_s3 }
 0x3d3   :  { %v433_v52 = vpop.xlane.xlu0 %432 }
 0x3d4   :  { %1758 = vrcp.f32 %v433_v52 }
 0x3d7   :  { %v599_v53 = vpop.xlane.xlu1 %598  ;;  %v603_v56 = vpop.permute.xlu0 %602 }
 0x3d8   :  { %1760 = vrcp.f32 %v599_v53 }
 0x3db   :  { %v1126_v59 = vpop.permute.xlu1 %1125 }
 0x3e1   :  { %v1759_v54 = vpop.eup %1758 }
 0x3e2   :  { %v435_v55 = vmul.f32 %v1759_v54, %v1743_v9 }
 0x3e4   :  { %1662 = vmatmul.mubr.msk.f32.vlgmr.msra.gmra.mxu1 %vm186_vm2, %v435_v55 }
 0x3e5   :  { %v1761_v57 = vpop.eup %1760  ;;  %1670 = vmatpush3.msra.mxu1 %v603_v56  ;;  %1671 = vmatprep.mubr.msk.f32.mxu1 %vm1866_vm1, %v1865_v6 }
 0x3e6   :  { %1679 = vmatprep.subr.mxu1 %v1865_v6  ;;  %v601_v58 = vmul.f32 %v1761_v57, %v2006_v20 }
 0x3e8   :  { %1672 = vmatmul.mubr.msk.f32.vlgmr.msra.gmra.mxu1 %vm186_vm2, %v601_v58 }
 0x3e9   :  { %1680 = vmatpush3.msra.mxu1 %v768_v51  ;;  %1681 = vmatprep.mubr.msk.f32.mxu1 %vm1866_vm1, %v1865_v6 }
 0x3ea   :  { %1689 = vmatprep.subr.mxu1 %v1865_v6 }
 0x408   :  { %v764_v60 = vpop.xlane.xlu0 %763 }
 0x409   :  { %1762 = vrcp.f32 %v764_v60 }
 0x40c   :  { %v959_v61 = vpop.xlane.xlu1 %958  ;;  %v1121_v62 = vpop.xlane.xlu0 %1120 }
 0x40d   :  { %1764 = vrcp.f32 %v959_v61 }
 0x40e   :  { %1766 = vrcp.f32 %v1121_v62 }
 0x410   :  { %v1287_v63 = vpop.xlane.xlu1 %1286  ;;  %v1452_v0 = vpop.xlane.xlu0 %1451 }
 0x411   :  { %1768 = vrcp.f32 %v1287_v63 }
 0x412   :  { %1770 = vrcp.f32 %v1452_v0 }
 0x414   :  { %v1291_v10 = vpop.permute.xlu0 %1290  ;;  %v1456_v13 = vpop.permute.xlu1 %1455 }
 0x416   :  { %v1763_v1 = vpop.eup %1762 }
 0x417   :  { %v766_v2 = vmul.f32 %v1763_v1, %v1747_v38 }
 0x419   :  { %1682 = vmatmul.mubr.msk.f32.vlgmr.msra.gmra.mxu1 %vm186_vm2, %v766_v2 }
 0x41a   :  { %v1765_v3 = vpop.eup %1764  ;;  %1690 = vmatpush3.msra.mxu1 %v2011_v24  ;;  %1691 = vmatprep.mubr.msk.f32.mxu1 %vm1866_vm1, %v1865_v6 }
 0x41b   :  { %1699 = vmatprep.subr.mxu1 %v1865_v6  ;;  %v961_v4 = vmul.f32 %v1765_v3, %v1749_v33  ;;  %v1767_v5 = vpop.eup %1766 }
 0x41c   :  { %v1123_v7 = vmul.f32 %v1767_v5, %v2018_v41 }
 0x41d   :  { %1692 = vmatmul.mubr.msk.f32.vlgmr.msra.gmra.mxu1 %vm186_vm2, %v961_v4 }
 0x41e   :  { %1700 = vmatpush3.msra.mxu1 %v1126_v59  ;;  %1701 = vmatprep.mubr.msk.f32.mxu1 %vm1866_vm1, %v1865_v6  ;;  %v1769_v8 = vpop.eup %1768 }
 0x41f   :  { %1709 = vmatprep.subr.mxu1 %v1865_v6  ;;  %v1289_v11 = vmul.f32 %v1769_v8, %v2020_v43  ;;  %v1771_v12 = vpop.eup %1770 }
 0x420   :  { %v1454_v14 = vmul.f32 %v1771_v12, %v2025_v46 }
 0x421   :  { %1702 = vmatmul.mubr.msk.f32.vlgmr.msra.gmra.mxu1 %vm186_vm2, %v1123_v7 }
 0x422   :  { %1710 = vmatpush3.msra.mxu1 %v1291_v10  ;;  %1711 = vmatprep.mubr.msk.f32.mxu1 %vm1866_vm1, %v1865_v6 }
 0x423   :  { %1719 = vmatprep.subr.mxu1 %v1865_v6 }
 0x425   :  { %1712 = vmatmul.mubr.msk.f32.vlgmr.msra.gmra.mxu1 %vm186_vm2, %v1289_v11 }
 0x426   :  { %1720 = vmatpush3.msra.mxu1 %v1456_v13  ;;  %1721 = vmatprep.mubr.msk.f32.mxu1 %vm1866_vm1, %v1865_v6 }
 0x429   :  { %1722 = vmatmul.mubr.msk.f32.vlgmr.msra.gmra.mxu1 %vm186_vm2, %v1454_v14 }
 0x450   :  { %v343_v15 = vpop.f32.mrf.mxu1 }
 0x452   :  { %v1653_v16 = vpop.f32.mrf.mxu1 }
 0x4a4   :  { %v509_v17 = vpop.f32.mrf.mxu1 }
 0x4a5   :  { %844 = vrot.lane.b32.xlu0 %v509_v17, %s1863_s26 }
 0x4a6   :  { %v1663_v9 = vpop.f32.mrf.mxu1 }
 0x4a8   :  { %v674_v18 = vpop.f32.mrf.mxu1 }
 0x4a9   :  { %848 = vrot.lane.b32.xlu1 %v674_v18, %s1859_s18 }
 0x4aa   :  { %v1673_v19 = vpop.f32.mrf.mxu1 }
 0x4d9   :  { %v839_v20 = vpop.f32.mrf.mxu1 }
 0x4da   :  { %852 = vrot.lane.b32.xlu0 %v839_v20, %s1872_s11 }
 0x4db   :  { %v1683_v21 = vpop.f32.mrf.mxu1 }
 0x4dd   :  { %v1031_v22 = vpop.f32.mrf.mxu1 }
 0x4df   :  { %v1693_v6 = vpop.f32.mrf.mxu1 }
 0x4e1   :  { %v1197_v23 = vpop.f32.mrf.mxu1 }
 0x4e2   :  { %1532 = vrot.lane.b32.xlu1 %v1197_v23, %s1863_s26 }
 0x4e3   :  { %v1703_v24 = vpop.f32.mrf.mxu1 }
 0x4e5   :  { %v1362_v25 = vpop.f32.mrf.mxu1 }
 0x4e6   :  { %1536 = vrot.lane.b32.xlu0 %v1362_v25, %s1859_s18 }
 0x4e7   :  { %v1713_v26 = vpop.f32.mrf.mxu1 }
 0x4e9   :  { %v1527_v27 = vpop.f32.mrf.mxu1 }
 0x4ea   :  { %1540 = vrot.lane.b32.xlu1 %v1527_v27, %s1872_s11 }
 0x4eb   :  { %v1723_v28 = vpop.f32.mrf.mxu1 }
 0x517   :  { %v845_v29 = vpop.permute.xlu0 %844 }
 0x518   :  { %v855_v31 = vsel %vm186_vm2, %v343_v15, %v845_v29 }
 0x51b   :  { %v849_v30 = vpop.permute.xlu1 %848 }
 0x51c   :  { %v857_v32 = vsel %vm856_vm3, %v855_v31, %v849_v30 }
 0x54c   :  { %v853_v34 = vpop.permute.xlu0 %852 }
 0x54d   :  { %v859_v35 = vsel %vm858_vm4, %v857_v32, %v853_v34 }
 0x54e   :  { %860 = vst.msk [vmem:[#allocation11] sm:$0xff] %vm72_vm0, %v859_v35 }
 0x554   :  { %v1533_v36 = vpop.permute.xlu1 %1532 }
 0x555   :  { %v1543_v38 = vsel %vm186_vm2, %v1031_v22, %v1533_v36 }
 0x558   :  { %v1537_v37 = vpop.permute.xlu0 %1536 }
 0x559   :  { %v1544_v39 = vsel %vm856_vm3, %v1543_v38, %v1537_v37 }
 0x55c   :  { %v1541_v33 = vpop.permute.xlu1 %1540 }
 0x55d   :  { %v1545_v40 = vsel %vm858_vm4, %v1544_v39, %v1541_v33 }
 0x55e   :  { %1547 = vst.msk [vmem:[#allocation11 + $0x8] sm:$0xff] %vm72_vm0, %v1545_v40 }
 0x55f   :  { %1843 = shalt.err (!%p1840_p5)
}
 0x560   :  { %1559 = dma.vmem_to_hbm [thread:$0]  %s1554_s13, 256, %s2086_s4, [#allocation7], %s1862_s25, %s1862_s25, %s1863_s26  }
 0x561   :  { %1856 = dma.done.wait [#allocation7], 256  }
 0x562   :  { %1857 = vsyncadd [#allocation7], 4294967040 }
 0x563   :  { %1563 = vsyncpa [#allocation6], 1 }
 0x564   :  { %1564 = vsyncpa [#allocation9], 1 }
 0x565   :  { %1565 = vsyncpa [#allocation7], 1 }

</bundles_post_ra>
